<compile_context>
chip_gen: v5e
topology: v5e:2x2
jax: 0.10.0
libtpu: 0.0.40
codegen_flags: <defaults>
</compile_context>

<pallas_src>
import math
import jax
import jax.numpy as jnp
from jax.experimental import pallas as pl
from jax.experimental.pallas import tpu as pltpu


def _round_up(x, m):
    return ((x + m - 1) // m) * m


def ffn_kernel(x_ref, w1_ref, b1_ref, w2_ref, b2_ref, o_ref, acc_ref):
    """Grid = (rows, d_ff chunks). d_ff is the reduction axis (last, arbitrary)."""
    k = pl.program_id(1)

    @pl.when(k == 0)
    def _():
        acc_ref[...] = jnp.zeros_like(acc_ref)

    # (tm, d_model) @ (d_model, tff) -> (tm, tff), f32 accumulation on the MXU.
    h = jnp.dot(x_ref[...], w1_ref[...], preferred_element_type=jnp.float32)
    h = jnp.maximum(h + b1_ref[...], 0.0)  # bias + ReLU in f32
    # (tm, tff) @ (tff, d_model) accumulated into the f32 scratch.
    acc_ref[...] += jnp.dot(h.astype(w2_ref.dtype), w2_ref[...],
                            preferred_element_type=jnp.float32)

    @pl.when(k == pl.num_programs(1) - 1)
    def _():
        o_ref[...] = (acc_ref[...] + b2_ref[...]).astype(o_ref.dtype)


def feed_forward(x, w1, b1, w2, b2, *, tm=256, tff=512):
    """x: (B, S, d_model). w1: (d_model, d_ff). w2: (d_ff, d_model)."""
    B, S, d_model = x.shape
    d_ff = w1.shape[1]
    M = B * S
    itemsize = jnp.dtype(x.dtype).itemsize

    # Effective tile sizes (shrink for small problems, keep (8,128) alignment).
    tm_e = min(tm, _round_up(M, 8))
    tff_e = min(tff, _round_up(d_ff, 128))

    # Padded problem sizes: lane-dense output, even grid, no runtime masking.
    M_pad = _round_up(M, tm_e)
    d_model_pad = _round_up(d_model, 128)
    d_ff_pad = _round_up(d_ff, tff_e)

    x2d = x.reshape(M, d_model)
    if (M_pad, d_model_pad) != (M, d_model):
        x2d = jnp.pad(x2d, ((0, M_pad - M), (0, d_model_pad - d_model)))
    w1p = w1 if (d_model_pad, d_ff_pad) == (d_model, d_ff) else jnp.pad(
        w1, ((0, d_model_pad - d_model), (0, d_ff_pad - d_ff)))
    w2p = w2 if (d_ff_pad, d_model_pad) == (d_ff, d_model) else jnp.pad(
        w2, ((0, d_ff_pad - d_ff), (0, d_model_pad - d_model)))
    b1p = (b1 if d_ff_pad == d_ff else jnp.pad(b1, (0, d_ff_pad - d_ff))
           ).reshape(1, d_ff_pad)
    b2p = (b2 if d_model_pad == d_model else jnp.pad(b2, (0, d_model_pad - d_model))
           ).reshape(1, d_model_pad)

    grid = (M_pad // tm_e, d_ff_pad // tff_e)

    # Explicit VMEM budget (double-buffered inputs/outputs + f32 accumulator),
    # with 2x headroom, capped at v7x's 64 MiB physical VMEM per TensorCore.
    working_set = (
        2 * tm_e * d_model_pad * itemsize          # x tiles
        + 2 * d_model_pad * tff_e * itemsize       # W1 chunks (streamed over k)
        + 2 * tff_e * itemsize                     # b1 chunks
        + 2 * tff_e * d_model_pad * itemsize       # W2 chunks (streamed over k)
        + 2 * d_model_pad * itemsize               # b2
        + 2 * tm_e * d_model_pad * itemsize        # out tiles
        + tm_e * d_model_pad * 4                   # f32 accumulator scratch
    )
    vmem_limit = min(64 * 1024 * 1024, 2 * working_set + (2 << 20))

    cost = pl.CostEstimate(
        flops=2 * M * d_model * d_ff + 2 * M * d_ff * d_model,
        transcendentals=0,
        bytes_accessed=(x2d.size + w1p.size + w2p.size + b1p.size + b2p.size
                        + M_pad * d_model_pad) * itemsize,
    )

    out2d = pl.pallas_call(
        ffn_kernel,
        out_shape=jax.ShapeDtypeStruct((M_pad, d_model_pad), x.dtype),
        grid_spec=pltpu.PrefetchScalarGridSpec(
            num_scalar_prefetch=0,
            grid=grid,
            in_specs=[
                pl.BlockSpec((tm_e, d_model_pad), lambda i, k: (i, 0)),   # x rows
                pl.BlockSpec((d_model_pad, tff_e), lambda i, k: (0, k)),  # W1 cols
                pl.BlockSpec((1, tff_e), lambda i, k: (0, k)),            # b1 chunk
                pl.BlockSpec((tff_e, d_model_pad), lambda i, k: (k, 0)),  # W2 rows
                pl.BlockSpec((1, d_model_pad), lambda i, k: (0, 0)),      # b2
            ],
            out_specs=pl.BlockSpec((tm_e, d_model_pad), lambda i, k: (i, 0)),
            scratch_shapes=[pltpu.VMEM((tm_e, d_model_pad), jnp.float32)],
        ),
        compiler_params=pltpu.CompilerParams(
            dimension_semantics=("parallel", "arbitrary"),
            vmem_limit_bytes=int(vmem_limit)),
        cost_estimate=cost,
    )(x2d, w1p, b1p, w2p, b2p)

    return out2d[:M, :d_model].reshape(B, S, d_model)


def init_params(key, d_model, d_ff, dtype=jnp.float32):
    """Deterministic init mirroring nn.Linear's default U(-1/sqrt(fan_in), +)."""
    k1, k2, k3, k4 = jax.random.split(key, 4)
    bound1 = 1.0 / math.sqrt(d_model)
    bound2 = 1.0 / math.sqrt(d_ff)
    # Stored transposed relative to PyTorch's (out, in) so the kernel does x @ W.
    w1 = jax.random.uniform(k1, (d_model, d_ff), dtype, -bound1, bound1)
    b1 = jax.random.uniform(k2, (d_ff,), dtype, -bound1, bound1)
    w2 = jax.random.uniform(k3, (d_ff, d_model), dtype, -bound2, bound2)
    b2 = jax.random.uniform(k4, (d_model,), dtype, -bound2, bound2)
    return w1, b1, w2, b2


if __name__ == "__main__":
    # Small but lane-aligned shapes (d_model, d_ff multiples of 128); M=16 is not
    # a multiple of the default tm=256, exercising the row-padding path.
    B, S, d_model, d_ff = 2, 8, 128, 256
    key = jax.random.PRNGKey(0)
    kx, kp = jax.random.split(key)
    x = jax.random.normal(kx, (B, S, d_model), jnp.float32)
    w1, b1, w2, b2 = init_params(kp, d_model, d_ff)

    # For production use: pass bf16 x/w1/w2 (accumulation stays f32 in-kernel).
    out = feed_forward(x, w1, b1, w2, b2)
    out = jax.block_until_ready(out)

    # Pure-JAX reference (same semantics as the PyTorch module).
    ref = jnp.maximum(x @ w1 + b1, 0.0) @ w2 + b2
    assert out.shape == (B, S, d_model)
    assert jnp.allclose(out, ref, atol=1e-4, rtol=1e-4)

    print("KERNEL_OK")
</pallas_src>

<mosaic_0001>
module attributes {stable_mosaic.version = 11 : i64} {
  func.func @ffn_kernel(%arg0: i32, %arg1: i32, %arg2: memref<16x128xf32, #tpu.memory_space<vmem>>, %arg3: memref<128x256xf32, #tpu.memory_space<vmem>>, %arg4: memref<1x256xf32, #tpu.memory_space<vmem>>, %arg5: memref<256x128xf32, #tpu.memory_space<vmem>>, %arg6: memref<1x128xf32, #tpu.memory_space<vmem>>, %arg7: memref<16x128xf32, #tpu.memory_space<vmem>>, %arg8: memref<16x128xf32, #tpu.memory_space<vmem>>) attributes {dimension_semantics = [#tpu.dimension_semantics<parallel>, #tpu.dimension_semantics<arbitrary>], iteration_bounds = array<i64: 1, 1>, scalar_prefetch = 0 : i64, scratch_operands = 1 : i64, tpu.core_type = #tpu.core_type<tc>, window_params = [{transform_indices = @transform_0, window_bounds = array<i64: 16, 128>}, {transform_indices = @transform_1, window_bounds = array<i64: 128, 256>}, {transform_indices = @transform_2, window_bounds = array<i64: 1, 256>}, {transform_indices = @transform_3, window_bounds = array<i64: 256, 128>}, {pipeline_mode = #tpu.pipeline_mode<synchronous>, transform_indices = @transform_4, window_bounds = array<i64: 1, 128>}, {transform_indices = @transform_5, window_bounds = array<i64: 16, 128>}]} {
    %c0_i32 = arith.constant 0 : i32
    %0 = arith.cmpi eq, %arg1, %c0_i32 : i32
    %1 = arith.extui %0 : i1 to i32
    %c0_i32_0 = arith.constant 0 : i32
    %2 = arith.cmpi ne, %1, %c0_i32_0 : i32
    scf.if %2 {
      %cst_16 = arith.constant 0.000000e+00 : f32
      %19 = vector.broadcast %cst_16 : f32 to vector<16x128xf32>
      %c0_17 = arith.constant 0 : index
      %c0_18 = arith.constant 0 : index
      %20 = vector.load %arg8[%c0_17, %c0_18] : memref<16x128xf32, #tpu.memory_space<vmem>>, vector<16x128xf32>
      tpu.vector_store %arg8[%c0_17, %c0_18], %19 {strides = array<i32>} : memref<16x128xf32, #tpu.memory_space<vmem>>, vector<16x128xf32>,
    } else {
    }
    %c0 = arith.constant 0 : index
    %c0_1 = arith.constant 0 : index
    %3 = vector.load %arg2[%c0, %c0_1] : memref<16x128xf32, #tpu.memory_space<vmem>>, vector<16x128xf32>
    %c0_2 = arith.constant 0 : index
    %c0_3 = arith.constant 0 : index
    %4 = vector.load %arg3[%c0_2, %c0_3] : memref<128x256xf32, #tpu.memory_space<vmem>>, vector<128x256xf32>
    %cst = arith.constant dense<0.000000e+00> : vector<16x256xf32>
    %5 = tpu.matmul %3, %4, %cst {dimension_numbers = #tpu.dot_dimension_numbers<[1], [0], [0], [1], [0, 0, 1, 1], [], []>} : vector<16x128xf32>, vector<128x256xf32>, vector<16x256xf32> -> vector<16x256xf32>
    %c0_4 = arith.constant 0 : index
    %c0_5 = arith.constant 0 : index
    %6 = vector.load %arg4[%c0_4, %c0_5] : memref<1x256xf32, #tpu.memory_space<vmem>>, vector<1x256xf32>
    %7 = vector.broadcast %6 : vector<1x256xf32> to vector<16x256xf32>
    %8 = arith.addf %5, %7 : vector<16x256xf32>
    %cst_6 = arith.constant 0.000000e+00 : f32
    %9 = vector.broadcast %cst_6 : f32 to vector<16x256xf32>
    %10 = arith.maximumf %8, %9 : vector<16x256xf32>
    %c0_7 = arith.constant 0 : index
    %c0_8 = arith.constant 0 : index
    %11 = vector.load %arg8[%c0_7, %c0_8] : memref<16x128xf32, #tpu.memory_space<vmem>>, vector<16x128xf32>
    %c0_9 = arith.constant 0 : index
    %c0_10 = arith.constant 0 : index
    %12 = vector.load %arg5[%c0_9, %c0_10] : memref<256x128xf32, #tpu.memory_space<vmem>>, vector<256x128xf32>
    %cst_11 = arith.constant dense<0.000000e+00> : vector<16x128xf32>
    %13 = tpu.matmul %10, %12, %cst_11 {dimension_numbers = #tpu.dot_dimension_numbers<[1], [0], [0], [1], [0, 0, 1, 1], [], []>} : vector<16x256xf32>, vector<256x128xf32>, vector<16x128xf32> -> vector<16x128xf32>
    %14 = arith.addf %11, %13 : vector<16x128xf32>
    %c0_12 = arith.constant 0 : index
    %c0_13 = arith.constant 0 : index
    %15 = vector.load %arg8[%c0_12, %c0_13] : memref<16x128xf32, #tpu.memory_space<vmem>>, vector<16x128xf32>
    tpu.vector_store %arg8[%c0_12, %c0_13], %14 {strides = array<i32>} : memref<16x128xf32, #tpu.memory_space<vmem>>, vector<16x128xf32>,
    %c0_i32_14 = arith.constant 0 : i32
    %16 = arith.cmpi eq, %arg1, %c0_i32_14 : i32
    %17 = arith.extui %16 : i1 to i32
    %c0_i32_15 = arith.constant 0 : i32
    %18 = arith.cmpi ne, %17, %c0_i32_15 : i32
    scf.if %18 {
      %c0_16 = arith.constant 0 : index
      %c0_17 = arith.constant 0 : index
      %19 = vector.load %arg8[%c0_16, %c0_17] : memref<16x128xf32, #tpu.memory_space<vmem>>, vector<16x128xf32>
      %c0_18 = arith.constant 0 : index
      %c0_19 = arith.constant 0 : index
      %20 = vector.load %arg6[%c0_18, %c0_19] : memref<1x128xf32, #tpu.memory_space<vmem>>, vector<1x128xf32>
      %21 = vector.broadcast %20 : vector<1x128xf32> to vector<16x128xf32>
      %22 = arith.addf %19, %21 : vector<16x128xf32>
      %c0_20 = arith.constant 0 : index
      %c0_21 = arith.constant 0 : index
      %23 = vector.load %arg7[%c0_20, %c0_21] : memref<16x128xf32, #tpu.memory_space<vmem>>, vector<16x128xf32>
      tpu.vector_store %arg7[%c0_20, %c0_21], %22 {strides = array<i32>} : memref<16x128xf32, #tpu.memory_space<vmem>>, vector<16x128xf32>,
    } else {
    }
    return
  }
  func.func @transform_0(%arg0: i32, %arg1: i32) -> (i32, i32) {
    %c0_i32 = arith.constant 0 : i32
    %c0_i32_0 = arith.constant 0 : i32
    return %arg0, %c0_i32 : i32, i32
  }
  func.func @transform_1(%arg0: i32, %arg1: i32) -> (i32, i32) {
    %c0_i32 = arith.constant 0 : i32
    %c0_i32_0 = arith.constant 0 : i32
    return %c0_i32, %arg1 : i32, i32
  }
  func.func @transform_2(%arg0: i32, %arg1: i32) -> (i32, i32) {
    %c0_i32 = arith.constant 0 : i32
    %c0_i32_0 = arith.constant 0 : i32
    return %c0_i32, %arg1 : i32, i32
  }
  func.func @transform_3(%arg0: i32, %arg1: i32) -> (i32, i32) {
    %c0_i32 = arith.constant 0 : i32
    %c0_i32_0 = arith.constant 0 : i32
    return %arg1, %c0_i32 : i32, i32
  }
  func.func @transform_4(%arg0: i32, %arg1: i32) -> (i32, i32) {
    %c0_i32 = arith.constant 0 : i32
    %c0_i32_0 = arith.constant 0 : i32
    %c0_i32_1 = arith.constant 0 : i32
    return %c0_i32, %c0_i32_0 : i32, i32
  }
  func.func @transform_5(%arg0: i32, %arg1: i32) -> (i32, i32) {
    %c0_i32 = arith.constant 0 : i32
    %c0_i32_0 = arith.constant 0 : i32
    return %arg0, %c0_i32 : i32, i32
  }
}

</mosaic_0001>

<bundles_post_ra>
// kernel: tpu_custom_call.1
= control target key start
LH: loop header
LB: loop body
LE: loop exit
PB: predicated region body
PF: predicated region fallthrough
CT: control target
= control target key end

     0   :  { %10 = vsyncpa [#allocation4], 0  ;;  %s500_s0 = inlined_call_operand.hbm [shape: f32[16,128], index: 0, kind: input, shape index: {}]   ;;  %s501_s1 = inlined_call_operand.hbm [shape: f32[128,256], index: 1, kind: input, shape index: {}]   ;;  %s502_s2 = inlined_call_operand.hbm [shape: f32[1,256], index: 2, kind: input, shape index: {}]   ;;  %s503_s3 = inlined_call_operand.hbm [shape: f32[256,128], index: 3, kind: input, shape index: {}]   ;;  %s504_s4 = inlined_call_operand.vmem [shape: f32[1,128], index: 4, kind: input, shape index: {}]   ;;  %s505_s5 = inlined_call_operand.hbm [shape: f32[16,128], index: 5, kind: output, shape index: {}]  }
   0x1   :  { %11 = vsyncpa [#allocation7], 0 }
   0x2   :  { %12 = vsyncpa [#allocation10], 0  ;;  %s31_s20 = sshll.u32 %s501_s1, 4  ;;  %s32_s20 = int_to_ptr.hbm [resolvable:$true] %s31_s20 }
   0x3   :  { %13 = vsyncpa [#allocation5], 0  ;;  %s434_s21 = smov [#allocation6]   ;;  %s18_s25 = sshll.u32 %s500_s0, 4  ;;  %s19_s25 = int_to_ptr.hbm [resolvable:$true] %s18_s25 }
   0x4   :  { %s33_s22 = sshll.u32 %s434_s21, 4  ;;  %s435_s26 = smov 256   ;;  %s34_s22 = int_to_ptr.vmem [resolvable:$true] %s33_s22 }
   0x5   :  { %s436_s27 = smov 16   ;;  %s437_s28 = smov [#allocation3]  }
   0x6   :  { %39 = dma.hbm_to_vmem [thread:$0]  %s32_s20, 4096, %s34_s22, [#allocation7], %s435_s26, %s435_s26, %s436_s27  }
   0x7   :  { %s20_s29 = sshll.u32 %s437_s28, 4  ;;  %s438_s30 = smov 128   ;;  %s21_s29 = int_to_ptr.vmem [resolvable:$true] %s20_s29 }
   0x8   :  { %s439_s6 = smov 8   ;;  %s45_s8 = sshll.u32 %s502_s2, 4  ;;  %s46_s8 = int_to_ptr.hbm [resolvable:$true] %s45_s8 }
   0x9   :  { %26 = dma.hbm_to_vmem [thread:$0]  %s19_s25, 256, %s21_s29, [#allocation4], %s438_s30, %s438_s30, %s439_s6  }
   0xa   :  { %s440_s9 = smov [#allocation8]   ;;  %s55_s12 = sshll.u32 %s503_s3, 4  ;;  %s56_s12 = int_to_ptr.hbm [resolvable:$true] %s55_s12 }
   0xb   :  { %s47_s0 = sshll.u32 %s440_s9, 4  ;;  %s441_s13 = smov [#allocation9]   ;;  %s48_s0 = int_to_ptr.vmem [resolvable:$true] %s47_s0 }
   0xc   :  { %50 = dma.hbm_to_vmem [thread:$0]  %s46_s8, 32, %s48_s0, [#allocation7]  }
   0xd   :  { %s57_s14 = sshll.u32 %s441_s13, 4  ;;  %s58_s14 = int_to_ptr.vmem [resolvable:$true] %s57_s14 }
   0xe   :  { %63 = dma.hbm_to_vmem [thread:$0]  %s56_s12, 4096, %s58_s14, [#allocation10], %s438_s30, %s438_s30, %s439_s6  }
   0xf   :  { %426 = dma.done.wait [#allocation4], 256  }
  0x10   :  { %427 = vsyncadd [#allocation4], 4294967040 }
  0x11   :  { %428 = dma.done.wait [#allocation7], 4128  }
  0x12   :  { %429 = vsyncadd [#allocation7], 4294963168 }
  0x13   :  { %430 = dma.done.wait [#allocation10], 4096  }
  0x14   :  { %431 = vsyncadd [#allocation10], 4294963200  ;;  %v120_v0 = vld [vmem:[#allocation6 + $0xf0] sm:$0xff]  ;;  %v121_v1 = vld [vmem:[#allocation6 + $0xf8] sm:$0xff]  ;;  %s442_s15 = smov [#allocation11]   ;;  %s281_s19 = sshll.u32 %s505_s5, 4  ;;  %s282_s19 = int_to_ptr.hbm [resolvable:$true] %s281_s19 }
  0x15   :  { %v118_v2 = vld [vmem:[#allocation6 + $0xe0] sm:$0xff]  ;;  %128 = vmatpush.msra.mxu0 %v120_v0  ;;  %151 = vmatpush.msra.mxu1 %v121_v1  ;;  %v119_v3 = vld [vmem:[#allocation6 + $0xe8] sm:$0xff]  ;;  %v116_v4 = vld [vmem:[#allocation6 + $0xd0] sm:$0xff]  ;;  %s279_s16 = sshll.u32 %s442_s15, 4  ;;  %s280_s16 = int_to_ptr.vmem [resolvable:$true] %s279_s16 }
  0x16   :  { %v117_v5 = vld [vmem:[#allocation6 + $0xd8] sm:$0xff]  ;;  %v114_v6 = vld [vmem:[#allocation6 + $0xc0] sm:$0xff]  ;;  %v115_v7 = vld [vmem:[#allocation6 + $0xc8] sm:$0xff] }
  0x17   :  { %129 = vmatpush.msra.mxu0 %v118_v2  ;;  %152 = vmatpush.msra.mxu1 %v119_v3  ;;  %v112_v8 = vld [vmem:[#allocation6 + $0xb0] sm:$0xff]  ;;  %v113_v9 = vld [vmem:[#allocation6 + $0xb8] sm:$0xff]  ;;  %v110_v10 = vld [vmem:[#allocation6 + $0xa0] sm:$0xff] }
  0x18   :  { %v111_v11 = vld [vmem:[#allocation6 + $0xa8] sm:$0xff]  ;;  %v108_v12 = vld [vmem:[#allocation6 + $0x90] sm:$0xff]  ;;  %v109_v13 = vld [vmem:[#allocation6 + $0x98] sm:$0xff] }
  0x19   :  { %130 = vmatpush.msra.mxu0 %v116_v4  ;;  %153 = vmatpush.msra.mxu1 %v117_v5  ;;  %v106_v14 = vld [vmem:[#allocation6 + $0x80] sm:$0xff]  ;;  %v107_v17 = vld [vmem:[#allocation6 + $0x88] sm:$0xff]  ;;  %v194_v18 = vld [vmem:[#allocation9 + $0x70] sm:$0xff] }
  0x1a   :  { %v195_v15 = vld [vmem:[#allocation9 + $0x78] sm:$0xff]  ;;  %v210_v19 = vld [vmem:[#allocation9 + $0xf0] sm:$0xff]  ;;  %v193_v20 = vld [vmem:[#allocation9 + $0x68] sm:$0xff] }
  0x1b   :  { %131 = vmatpush.msra.mxu0 %v114_v6  ;;  %154 = vmatpush.msra.mxu1 %v115_v7  ;;  %v211_v16 = vld [vmem:[#allocation9 + $0xf8] sm:$0xff]  ;;  %v209_v21 = vld [vmem:[#allocation9 + $0xe8] sm:$0xff]  ;;  %v192_v24 = vld [vmem:[#allocation9 + $0x60] sm:$0xff] }
  0x1c   :  { %212 = vmatpush.msra.mxu2 %v195_v15  ;;  %235 = vmatpush.msra.mxu3 %v211_v16  ;;  %v104_v22 = vld [vmem:[#allocation6 + $0x70] sm:$0xff]  ;;  %v105_v23 = vld [vmem:[#allocation6 + $0x78] sm:$0xff]  ;;  %v208_v25 = vld [vmem:[#allocation9 + $0xe0] sm:$0xff] }
  0x1d   :  { %132 = vmatpush.msra.mxu0 %v112_v8  ;;  %155 = vmatpush.msra.mxu1 %v113_v9  ;;  %v102_v26 = vld [vmem:[#allocation6 + $0x60] sm:$0xff]  ;;  %v103_v27 = vld [vmem:[#allocation6 + $0x68] sm:$0xff]  ;;  %v100_v30 = vld [vmem:[#allocation6 + $0x50] sm:$0xff] }
  0x1e   :  { %213 = vmatpush.msra.mxu2 %v194_v18  ;;  %236 = vmatpush.msra.mxu3 %v210_v19  ;;  %v191_v28 = vld [vmem:[#allocation9 + $0x58] sm:$0xff]  ;;  %v190_v32 = vld [vmem:[#allocation9 + $0x50] sm:$0xff]  ;;  %v99_v35 = vld [vmem:[#allocation6 + $0x48] sm:$0xff] }
  0x1f   :  { %133 = vmatpush.msra.mxu0 %v110_v10  ;;  %156 = vmatpush.msra.mxu1 %v111_v11  ;;  %v207_v29 = vld [vmem:[#allocation9 + $0xd8] sm:$0xff]  ;;  %v206_v33 = vld [vmem:[#allocation9 + $0xd0] sm:$0xff]  ;;  %v189_v36 = vld [vmem:[#allocation9 + $0x48] sm:$0xff] }
  0x20   :  { %214 = vmatpush.msra.mxu2 %v193_v20  ;;  %237 = vmatpush.msra.mxu3 %v209_v21  ;;  %v101_v31 = vld [vmem:[#allocation6 + $0x58] sm:$0xff]  ;;  %v98_v34 = vld [vmem:[#allocation6 + $0x40] sm:$0xff]  ;;  %v205_v37 = vld [vmem:[#allocation9 + $0xc8] sm:$0xff] }
  0x21   :  { %134 = vmatpush.msra.mxu0 %v108_v12  ;;  %157 = vmatpush.msra.mxu1 %v109_v13  ;;  %v96_v38 = vld [vmem:[#allocation6 + $0x30] sm:$0xff]  ;;  %v97_v39 = vld [vmem:[#allocation6 + $0x38] sm:$0xff]  ;;  %v188_v40 = vld [vmem:[#allocation9 + $0x40] sm:$0xff] }
  0x22   :  { %215 = vmatpush.msra.mxu2 %v192_v24  ;;  %238 = vmatpush.msra.mxu3 %v208_v25  ;;  %v204_v41 = vld [vmem:[#allocation9 + $0xc0] sm:$0xff]  ;;  %v187_v44 = vld [vmem:[#allocation9 + $0x38] sm:$0xff]  ;;  %v92_v46 = vld [vmem:[#allocation6 + $0x10] sm:$0xff] }
  0x23   :  { %135 = vmatpush.msra.mxu0 %v106_v14  ;;  %158 = vmatpush.msra.mxu1 %v107_v17  ;;  %v94_v42 = vld [vmem:[#allocation6 + $0x20] sm:$0xff]  ;;  %v95_v43 = vld [vmem:[#allocation6 + $0x28] sm:$0xff]  ;;  %v93_v47 = vld [vmem:[#allocation6 + $0x18] sm:$0xff] }
  0x24   :  { %216 = vmatpush.msra.mxu2 %v191_v28  ;;  %239 = vmatpush.msra.mxu3 %v207_v29  ;;  %v203_v45 = vld [vmem:[#allocation9 + $0xb8] sm:$0xff]  ;;  %v186_v48 = vld [vmem:[#allocation9 + $0x30] sm:$0xff]  ;;  %v91_v51 = vld [vmem:[#allocation6 + $0x8] sm:$0xff] }
  0x25   :  { %136 = vmatpush.msra.mxu0 %v104_v22  ;;  %159 = vmatpush.msra.mxu1 %v105_v23  ;;  %v202_v49 = vld [vmem:[#allocation9 + $0xb0] sm:$0xff]  ;;  %v90_v50 = vld [vmem:[#allocation6] sm:$0xff]  ;;  %v185_v53 = vld [vmem:[#allocation9 + $0x28] sm:$0xff] }
  0x26   :  { %217 = vmatpush.msra.mxu2 %v190_v32  ;;  %240 = vmatpush.msra.mxu3 %v206_v33  ;;  %v88_v52 = vld [vmem:[#allocation3] sm:$0xff]  ;;  %v184_v55 = vld [vmem:[#allocation9 + $0x20] sm:$0xff]  ;;  %v183_v57 = vld [vmem:[#allocation9 + $0x18] sm:$0xff] }
  0x27   :  { %137 = vmatpush.msra.mxu0 %v102_v26  ;;  %160 = vmatpush.msra.mxu1 %v103_v27  ;;  %v201_v54 = vld [vmem:[#allocation9 + $0xa8] sm:$0xff]  ;;  %v200_v56 = vld [vmem:[#allocation9 + $0xa0] sm:$0xff]  ;;  %v199_v58 = vld [vmem:[#allocation9 + $0x98] sm:$0xff] }
  0x28   :  { %218 = vmatpush.msra.mxu2 %v189_v36  ;;  %241 = vmatpush.msra.mxu3 %v205_v37  ;;  %v89_v59 = vld [vmem:[#allocation3 + $0x8] sm:$0xff]  ;;  %v181_v62 = vld [vmem:[#allocation9 + $0x8] sm:$0xff]  ;;  %v180_v0 = vld [vmem:[#allocation9] sm:$0xff] }
  0x29   :  { %138 = vmatpush.msra.mxu0 %v100_v30  ;;  %161 = vmatpush.msra.mxu1 %v101_v31  ;;  %v182_v60 = vld [vmem:[#allocation9 + $0x10] sm:$0xff]  ;;  %v197_v63 = vld [vmem:[#allocation9 + $0x88] sm:$0xff]  ;;  %v196_v1 = vld [vmem:[#allocation9 + $0x80] sm:$0xff] }
  0x2a   :  { %219 = vmatpush.msra.mxu2 %v188_v40  ;;  %242 = vmatpush.msra.mxu3 %v204_v41  ;;  %v198_v61 = vld [vmem:[#allocation9 + $0x90] sm:$0xff]  ;;  %v122_v2 = vld [vmem:[#allocation8] sm:$0x3]  ;;  %v305_v17 = vld [vmem:[%s504_s4] ss:$0 sm:$0xff] }
  0x2b   :  { %139 = vmatpush.msra.mxu0 %v98_v34  ;;  %162 = vmatpush.msra.mxu1 %v99_v35  ;;  %v124_v3 = vperm.slane %v122_v2, 0  ;;  %v125_v4 = vperm.slane %v122_v2, 1 }
  0x2c   :  { %220 = vmatpush.msra.mxu2 %v187_v44  ;;  %243 = vmatpush.msra.mxu3 %v203_v45 }
  0x2d   :  { %140 = vmatpush.msra.mxu0 %v96_v38  ;;  %163 = vmatpush.msra.mxu1 %v97_v39 }
  0x2e   :  { %221 = vmatpush.msra.mxu2 %v186_v48  ;;  %244 = vmatpush.msra.mxu3 %v202_v49 }
  0x2f   :  { %141 = vmatpush.msra.mxu0 %v94_v42  ;;  %164 = vmatpush.msra.mxu1 %v95_v43 }
  0x30   :  { %222 = vmatpush.msra.mxu2 %v185_v53  ;;  %245 = vmatpush.msra.mxu3 %v201_v54 }
  0x31   :  { %142 = vmatpush.msra.mxu0 %v92_v46  ;;  %165 = vmatpush.msra.mxu1 %v93_v47 }
  0x32   :  { %223 = vmatpush.msra.mxu2 %v184_v55  ;;  %246 = vmatpush.msra.mxu3 %v200_v56 }
  0x33   :  { %143 = vmatpush.msra.mxu0 %v90_v50  ;;  %166 = vmatpush.msra.mxu1 %v91_v51 }
  0x34   :  { %144 = vmatmul.f32.vlgmr.msra.gmra.mxu0 %v88_v52  ;;  %167 = vmatmul.f32.vlgmr.msra.gmra.mxu1 %v88_v52 }
  0x35   :  { %224 = vmatpush.msra.mxu2 %v183_v57  ;;  %247 = vmatpush.msra.mxu3 %v199_v58 }
  0x37   :  { %225 = vmatpush.msra.mxu2 %v182_v60  ;;  %248 = vmatpush.msra.mxu3 %v198_v61 }
  0x39   :  { %226 = vmatpush.msra.mxu2 %v181_v62  ;;  %249 = vmatpush.msra.mxu3 %v197_v63 }
  0x3b   :  { %227 = vmatpush.msra.mxu2 %v180_v0  ;;  %250 = vmatpush.msra.mxu3 %v196_v1 }
  0x3c   :  { %147 = vmatmul.f32.gmra.mxu0 %v89_v59  ;;  %170 = vmatmul.f32.gmra.mxu1 %v89_v59 }
  0xb1   :  { %v145_v5 = vpop.f32.mrf.mxu0  ;;  %v168_v6 = vpop.f32.mrf.mxu1 }
  0xb2   :  { %v146_v7 = vadd.f32 %v145_v5, %v124_v3  ;;  %v169_v8 = vadd.f32 %v168_v6, %v125_v4 }
  0xb4   :  { %v174_v9 = vmax.f32 %v146_v7, 0.0  ;;  %v175_v10 = vmax.f32 %v169_v8, 0.0 }
  0xb6   :  { %228 = vmatmul.f32.vlgmr.msra.gmra.mxu2 %v174_v9  ;;  %251 = vmatmul.f32.vlgmr.msra.gmra.mxu3 %v175_v10 }
  0xb9   :  { %v148_v11 = vpop.f32.mrf.mxu0  ;;  %v171_v12 = vpop.f32.mrf.mxu1 }
  0xba   :  { %v149_v13 = vadd.f32 %v148_v11, %v124_v3  ;;  %v172_v14 = vadd.f32 %v171_v12, %v125_v4 }
  0xbc   :  { %v176_v15 = vmax.f32 %v149_v13, 0.0  ;;  %v177_v16 = vmax.f32 %v172_v14, 0.0 }
  0xbe   :  { %231 = vmatmul.f32.gmra.mxu2 %v176_v15  ;;  %254 = vmatmul.f32.gmra.mxu3 %v177_v16 }
 0x139   :  { %v229_v18 = vpop.f32.mrf.mxu2  ;;  %v252_v19 = vpop.f32.mrf.mxu3 }
 0x13a   :  { %v253_v20 = vadd.f32 %v252_v19, %v229_v18 }
 0x13c   :  { %v271_v21 = vadd.f32 %v305_v17, %v253_v20 }
 0x13e   :  { %273 = vst [vmem:[#allocation11] sm:$0xff] %v271_v21 }
 0x141   :  { %v232_v22 = vpop.f32.mrf.mxu2  ;;  %v255_v23 = vpop.f32.mrf.mxu3 }
 0x142   :  { %v256_v24 = vadd.f32 %v255_v23, %v232_v22 }
 0x144   :  { %v272_v25 = vadd.f32 %v305_v17, %v256_v24 }
 0x146   :  { %274 = vst [vmem:[#allocation11 + $0x8] sm:$0xff] %v272_v25 }
 0x147   :  { %287 = dma.vmem_to_hbm [thread:$0]  %s280_s16, 256, %s282_s19, [#allocation5], %s438_s30, %s438_s30, %s439_s6  }
 0x148   :  { %432 = dma.done.wait [#allocation5], 256  }
 0x149   :  { %433 = vsyncadd [#allocation5], 4294967040 }
 0x14a   :  { %292 = vsyncpa [#allocation4], 1 }
 0x14b   :  { %293 = vsyncpa [#allocation7], 1 }
 0x14c   :  { %294 = vsyncpa [#allocation10], 1 }
 0x14d   :  { %295 = vsyncpa [#allocation5], 1 }

</bundles_post_ra>
